<compile_context>
chip_gen: v7x
topology: tpu7x:2x2x1
jax: 0.10.0
libtpu: 0.0.40
codegen_flags: <defaults>
</compile_context>

<pallas_src>
import functools

import jax
import jax.numpy as jnp
from jax import lax
from jax.experimental import pallas as pl
from jax.experimental.pallas import tpu as pltpu


def _flash_attn_kernel(q_ref, k_ref, v_ref, xres_ref, gamma_ref, o_ref,
                       m_sc, l_sc, acc_sc, *, tile_k, n_valid, needs_mask):
    ki = pl.program_id(2)
    n_kv = pl.num_programs(2)

    # ---- per-(batch, query-tile) init: runs once, at the first KV step ------
    @pl.when(ki == 0)
    def _init():
        m_sc[...] = jnp.full(m_sc.shape, -jnp.inf, dtype=m_sc.dtype)
        l_sc[...] = jnp.zeros(l_sc.shape, dtype=l_sc.dtype)
        acc_sc[...] = jnp.zeros(acc_sc.shape, dtype=acc_sc.dtype)

    q = q_ref[0]                                              # (TQ, C8) bf16
    k = k_ref[0]                                              # (C8, TK) bf16
    v = v_ref[0]                                              # (TK, C)  bf16

    # scores: canonical (M,K)x(K,N) -> MXU, no in-kernel transpose
    s = jnp.dot(q, k, preferred_element_type=jnp.float32)     # (TQ, TK) f32

    if needs_mask:  # static: only when N was padded up to the tile size
        col = ki * tile_k + lax.broadcasted_iota(jnp.int32, s.shape, 1)
        s = jnp.where(col < n_valid, s, -1e30)

    # ---- online softmax accumulation (f32 elementwise math) -----------------
    m_prev = m_sc[...]                                        # (TQ, 1)
    m_new = jnp.maximum(m_prev, jnp.max(s, axis=-1, keepdims=True))
    alpha = jnp.exp(m_prev - m_new)                           # (TQ, 1)
    p = jnp.exp(s - m_new)                                    # (TQ, TK) f32
    l_sc[...] = alpha * l_sc[...] + jnp.sum(p, axis=-1, keepdims=True)
    acc_sc[...] = alpha * acc_sc[...] + jnp.dot(
        p.astype(v.dtype), v, preferred_element_type=jnp.float32)
    m_sc[...] = m_new

    # ---- finalize: normalize once, gamma + residual, write tile -------------
    @pl.when(ki == n_kv - 1)
    def _finalize():
        inv_l = pl.reciprocal(l_sc[...], approx=True)         # (TQ, 1)
        out = acc_sc[...] * inv_l                             # (TQ, C) f32
        o_ref[0] = (gamma_ref[0] * out + xres_ref[0]).astype(o_ref.dtype)


def _round_up(x, m):
    return -(-x // m) * m


def _pick_tile(n, cap=256):
    """Capped tile; awkward N is handled by padding + masking, never full-N."""
    if n <= cap:
        return _round_up(max(n, 8), 8)
    return cap


def self_attention_pallas(x_nchw, wq, bq, wk, bk, wv, bv, gamma,
                          *, compute_dtype=jnp.bfloat16,
                          tile_q=None, tile_k=None, tile_cap=256):
    B, C, H, W = x_nchw.shape
    N = H * W
    C8 = wq.shape[0]

    xf = x_nchw.reshape(B, C, N)
    xc = xf.astype(compute_dtype)

    # ---- hoisted 1x1-conv projections (outside the attention kernel) --------
    # q / v fused into one matmul, emitted channel-minor (layout transpose is
    # folded into the einsum output spec instead of a separate HBM pass).
    w_qv = jnp.concatenate([wq, wv], axis=0).astype(compute_dtype)     # (C8+C, C)
    b_qv = jnp.concatenate([bq, bv]).astype(jnp.float32)               # (C8+C,)
    qv = jnp.einsum('oc,bcn->bno', w_qv, xc,
                    preferred_element_type=jnp.float32) + b_qv[None, None, :]
    q = qv[..., :C8].astype(compute_dtype)                             # (B, N, C8)
    v = qv[..., C8:].astype(compute_dtype)                             # (B, N, C)
    # K kept (B, C8, N): score matmul is q(TQ,C8) @ k(C8,TK), lane-dense on N.
    k = (jnp.einsum('oc,bcn->bon', wk.astype(compute_dtype), xc,
                    preferred_element_type=jnp.float32)
         + bk.astype(jnp.float32)[None, :, None]).astype(compute_dtype)  # (B, C8, N)

    # residual path, channel-minor, f32 (exact pass-through when gamma == 0)
    x_res = jnp.transpose(xf, (0, 2, 1)).astype(jnp.float32)           # (B, N, C)

    tq = _pick_tile(N, tile_cap) if tile_q is None else tile_q
    tk = _pick_tile(N, tile_cap) if tile_k is None else tile_k
    n_pad_q = _round_up(N, tq)
    n_pad_k = _round_up(N, tk)

    # v7x megacore occupancy: make sure there are >= 2 "parallel" programs.
    if tile_q is None and B == 1 and n_pad_q // tq == 1:
        half = n_pad_q // 2
        if half >= 8 and half % 8 == 0:
            tq = half

    if n_pad_q != N:
        q = jnp.pad(q, ((0, 0), (0, n_pad_q - N), (0, 0)))
        x_res = jnp.pad(x_res, ((0, 0), (0, n_pad_q - N), (0, 0)))
    if n_pad_k != N:
        k = jnp.pad(k, ((0, 0), (0, 0), (0, n_pad_k - N)))
        v = jnp.pad(v, ((0, 0), (0, n_pad_k - N), (0, 0)))

    grid = (B, n_pad_q // tq, n_pad_k // tk)
    needs_mask = (n_pad_k != N)
    gamma1 = gamma.reshape(1).astype(jnp.float32)

    kernel = functools.partial(_flash_attn_kernel, tile_k=tk, n_valid=N,
                               needs_mask=needs_mask)

    out = pl.pallas_call(
        kernel,
        out_shape=jax.ShapeDtypeStruct((B, n_pad_q, C), jnp.float32),
        grid=grid,
        in_specs=[
            pl.BlockSpec((1, tq, C8), lambda b, qi, ki: (b, qi, 0)),   # q tile
            pl.BlockSpec((1, C8, tk), lambda b, qi, ki: (b, 0, ki)),   # k tile (C8, TK)
            pl.BlockSpec((1, tk, C), lambda b, qi, ki: (b, ki, 0)),    # v tile
            pl.BlockSpec((1, tq, C), lambda b, qi, ki: (b, qi, 0)),    # residual tile
            pl.BlockSpec(memory_space=pltpu.SMEM),                     # gamma scalar
        ],
        out_specs=pl.BlockSpec((1, tq, C), lambda b, qi, ki: (b, qi, 0)),
        scratch_shapes=[
            pltpu.VMEM((tq, 1), jnp.float32),   # running max
            pltpu.VMEM((tq, 1), jnp.float32),   # running denominator
            pltpu.VMEM((tq, C), jnp.float32),   # output accumulator
        ],
        compiler_params=pltpu.CompilerParams(
            dimension_semantics=("parallel", "parallel", "arbitrary"),
            vmem_limit_bytes=32 * 1024 * 1024,
        ),
    )(q, k, v, x_res, gamma1)

    if n_pad_q != N:
        out = out[:, :N, :]
    return jnp.transpose(out, (0, 2, 1)).reshape(B, C, H, W)


def self_attention_ref(x_nchw, wq, bq, wk, bk, wv, bv, gamma):
    """Pure-JAX f32 reference mirroring the PyTorch forward exactly."""
    B, C, H, W = x_nchw.shape
    N = H * W
    xf = x_nchw.reshape(B, C, N)                                    # (B, C, N)
    q = jnp.einsum('oc,bcn->bon', wq, xf) + bq[None, :, None]       # (B, C8, N)
    k = jnp.einsum('oc,bcn->bon', wk, xf) + bk[None, :, None]       # (B, C8, N)
    v = jnp.einsum('oc,bcn->bon', wv, xf) + bv[None, :, None]       # (B, C, N)
    attn = jnp.einsum('bci,bcj->bij', q, k)                         # (B, N, N)
    attn = jax.nn.softmax(attn, axis=-1)
    out = jnp.einsum('bcj,bij->bci', v, attn)                       # (B, C, N)
    return (gamma[0] * out + xf).reshape(B, C, H, W)


def _run_case(key, B, C, H, W):
    C8 = max(C // 8, 1)
    kx, kwq, kbq, kwk, kbk, kwv, kbv = jax.random.split(key, 7)
    x = jax.random.normal(kx, (B, C, H, W), dtype=jnp.float32)
    wq = jax.random.normal(kwq, (C8, C), dtype=jnp.float32) * 0.1
    bq = jax.random.normal(kbq, (C8,), dtype=jnp.float32) * 0.1
    wk = jax.random.normal(kwk, (C8, C), dtype=jnp.float32) * 0.1
    bk = jax.random.normal(kbk, (C8,), dtype=jnp.float32) * 0.1
    wv = jax.random.normal(kwv, (C, C), dtype=jnp.float32) * 0.1
    bv = jax.random.normal(kbv, (C,), dtype=jnp.float32) * 0.1

    # gamma is initialized to zero in the module; also test a nonzero value so
    # the attention path is actually exercised.
    for gval in (0.0, 0.5):
        gamma = jnp.array([gval], dtype=jnp.float32)
        y = self_attention_pallas(x, wq, bq, wk, bk, wv, bv, gamma)
        y = jax.block_until_ready(y)
        y_ref = self_attention_ref(x, wq, bq, wk, bk, wv, bv, gamma)
        assert y.shape == (B, C, H, W)
        err = float(jnp.max(jnp.abs(y - y_ref)))
        # bf16 MXU operands (f32 accumulation) => allow a few 1e-3 abs error.
        assert jnp.allclose(y, y_ref, atol=2e-2, rtol=2e-2), (
            f"mismatch at shape {(B, C, H, W)}, gamma={gval}: max err {err}")


if __name__ == "__main__":
    key = jax.random.PRNGKey(0)
    k1, k2 = jax.random.split(key)
    # divisible N (no padding path)
    _run_case(k1, B=2, C=16, H=8, W=8)
    # awkward N = 36 -> exercises the pad + in-kernel key-mask path
    _run_case(k2, B=1, C=32, H=6, W=6)
    print("KERNEL_OK")
</pallas_src>

<mosaic_0001>
module attributes {stable_mosaic.version = 11 : i64} {
  func.func @_flash_attn_kernel(%arg0: i32, %arg1: i32, %arg2: i32, %arg3: memref<1x64x2xbf16, #tpu.memory_space<vmem>>, %arg4: memref<1x2x64xbf16, #tpu.memory_space<vmem>>, %arg5: memref<1x64x16xbf16, #tpu.memory_space<vmem>>, %arg6: memref<1x64x16xf32, #tpu.memory_space<vmem>>, %arg7: memref<1xf32, #tpu.memory_space<smem>>, %arg8: memref<1x64x16xf32, #tpu.memory_space<vmem>>, %arg9: memref<64x1xf32, #tpu.memory_space<vmem>>, %arg10: memref<64x1xf32, #tpu.memory_space<vmem>>, %arg11: memref<64x16xf32, #tpu.memory_space<vmem>>) attributes {dimension_semantics = [#tpu.dimension_semantics<parallel>, #tpu.dimension_semantics<parallel>, #tpu.dimension_semantics<arbitrary>], iteration_bounds = array<i64: 2, 1, 1>, scalar_prefetch = 0 : i64, scratch_operands = 3 : i64, tpu.core_type = #tpu.core_type<tc>, window_params = [{transform_indices = @transform_0, window_bounds = array<i64: 1, 64, 2>}, {transform_indices = @transform_1, window_bounds = array<i64: 1, 2, 64>}, {transform_indices = @transform_2, window_bounds = array<i64: 1, 64, 16>}, {transform_indices = @transform_3, window_bounds = array<i64: 1, 64, 16>}, {transform_indices = @transform_4, window_bounds = array<i64: 1>}, {transform_indices = @transform_5, window_bounds = array<i64: 1, 64, 16>}]} {
    %c0_i32 = arith.constant 0 : i32
    %0 = arith.cmpi eq, %arg2, %c0_i32 : i32
    %1 = arith.extui %0 : i1 to i32
    %c0_i32_0 = arith.constant 0 : i32
    %2 = arith.cmpi ne, %1, %c0_i32_0 : i32
    scf.if %2 {
      %cst_26 = arith.constant 0xFF800000 : f32
      %36 = vector.broadcast %cst_26 : f32 to vector<64x1xf32>
      %c0_27 = arith.constant 0 : index
      %c0_28 = arith.constant 0 : index
      %37 = vector.load %arg9[%c0_27, %c0_28] : memref<64x1xf32, #tpu.memory_space<vmem>>, vector<64x1xf32>
      tpu.vector_store %arg9[%c0_27, %c0_28], %36 {strides = array<i32>} : memref<64x1xf32, #tpu.memory_space<vmem>>, vector<64x1xf32>,
      %cst_29 = arith.constant 0.000000e+00 : f32
      %38 = vector.broadcast %cst_29 : f32 to vector<64x1xf32>
      %c0_30 = arith.constant 0 : index
      %c0_31 = arith.constant 0 : index
      %39 = vector.load %arg10[%c0_30, %c0_31] : memref<64x1xf32, #tpu.memory_space<vmem>>, vector<64x1xf32>
      tpu.vector_store %arg10[%c0_30, %c0_31], %38 {strides = array<i32>} : memref<64x1xf32, #tpu.memory_space<vmem>>, vector<64x1xf32>,
      %cst_32 = arith.constant 0.000000e+00 : f32
      %40 = vector.broadcast %cst_32 : f32 to vector<64x16xf32>
      %c0_33 = arith.constant 0 : index
      %c0_34 = arith.constant 0 : index
      %41 = vector.load %arg11[%c0_33, %c0_34] : memref<64x16xf32, #tpu.memory_space<vmem>>, vector<64x16xf32>
      tpu.vector_store %arg11[%c0_33, %c0_34], %40 {strides = array<i32>} : memref<64x16xf32, #tpu.memory_space<vmem>>, vector<64x16xf32>,
    } else {
    }
    %c0 = arith.constant 0 : index
    %c0_1 = arith.constant 0 : index
    %c0_2 = arith.constant 0 : index
    %3 = vector.load %arg3[%c0, %c0_1, %c0_2] : memref<1x64x2xbf16, #tpu.memory_space<vmem>>, vector<1x64x2xbf16>
    %4 = vector.shape_cast %3 : vector<1x64x2xbf16> to vector<64x2xbf16>
    %c0_3 = arith.constant 0 : index
    %c0_4 = arith.constant 0 : index
    %c0_5 = arith.constant 0 : index
    %5 = vector.load %arg4[%c0_3, %c0_4, %c0_5] : memref<1x2x64xbf16, #tpu.memory_space<vmem>>, vector<1x2x64xbf16>
    %6 = vector.shape_cast %5 : vector<1x2x64xbf16> to vector<2x64xbf16>
    %c0_6 = arith.constant 0 : index
    %c0_7 = arith.constant 0 : index
    %c0_8 = arith.constant 0 : index
    %7 = vector.load %arg5[%c0_6, %c0_7, %c0_8] : memref<1x64x16xbf16, #tpu.memory_space<vmem>>, vector<1x64x16xbf16>
    %8 = vector.shape_cast %7 : vector<1x64x16xbf16> to vector<64x16xbf16>
    %cst = arith.constant dense<0.000000e+00> : vector<64x64xf32>
    %9 = tpu.matmul %4, %6, %cst {dimension_numbers = #tpu.dot_dimension_numbers<[1], [0], [0], [1], [0, 0, 1, 1], [], []>} : vector<64x2xbf16>, vector<2x64xbf16>, vector<64x64xf32> -> vector<64x64xf32>
    %c0_9 = arith.constant 0 : index
    %c0_10 = arith.constant 0 : index
    %10 = vector.load %arg9[%c0_9, %c0_10] : memref<64x1xf32, #tpu.memory_space<vmem>>, vector<64x1xf32>
    %cst_11 = arith.constant dense<0xFF800000> : vector<64xf32>
    %11 = vector.multi_reduction <maximumf>, %9, %cst_11 [1] : vector<64x64xf32> to vector<64xf32>
    %12 = vector.shape_cast %11 : vector<64xf32> to vector<64x1xf32>
    %13 = arith.maximumf %10, %12 : vector<64x1xf32>
    %14 = arith.subf %10, %13 : vector<64x1xf32>
    %15 = math.exp %14 : vector<64x1xf32>
    %16 = vector.broadcast %13 : vector<64x1xf32> to vector<64x64xf32>
    %17 = arith.subf %9, %16 : vector<64x64xf32>
    %18 = math.exp %17 : vector<64x64xf32>
    %c0_12 = arith.constant 0 : index
    %c0_13 = arith.constant 0 : index
    %19 = vector.load %arg10[%c0_12, %c0_13] : memref<64x1xf32, #tpu.memory_space<vmem>>, vector<64x1xf32>
    %20 = arith.mulf %15, %19 : vector<64x1xf32>
    %cst_14 = arith.constant dense<0.000000e+00> : vector<64xf32>
    %21 = vector.multi_reduction <add>, %18, %cst_14 [1] : vector<64x64xf32> to vector<64xf32>
    %22 = vector.shape_cast %21 : vector<64xf32> to vector<64x1xf32>
    %23 = arith.addf %20, %22 : vector<64x1xf32>
    %c0_15 = arith.constant 0 : index
    %c0_16 = arith.constant 0 : index
    %24 = vector.load %arg10[%c0_15, %c0_16] : memref<64x1xf32, #tpu.memory_space<vmem>>, vector<64x1xf32>
    tpu.vector_store %arg10[%c0_15, %c0_16], %23 {strides = array<i32>} : memref<64x1xf32, #tpu.memory_space<vmem>>, vector<64x1xf32>,
    %c0_17 = arith.constant 0 : index
    %c0_18 = arith.constant 0 : index
    %25 = vector.load %arg11[%c0_17, %c0_18] : memref<64x16xf32, #tpu.memory_space<vmem>>, vector<64x16xf32>
    %26 = vector.broadcast %15 : vector<64x1xf32> to vector<64x16xf32>
    %27 = arith.mulf %26, %25 : vector<64x16xf32>
    %28 = arith.truncf %18 : vector<64x64xf32> to vector<64x64xbf16>
    %cst_19 = arith.constant dense<0.000000e+00> : vector<64x16xf32>
    %29 = tpu.matmul %28, %8, %cst_19 {dimension_numbers = #tpu.dot_dimension_numbers<[1], [0], [0], [1], [0, 0, 1, 1], [], []>} : vector<64x64xbf16>, vector<64x16xbf16>, vector<64x16xf32> -> vector<64x16xf32>
    %30 = arith.addf %27, %29 : vector<64x16xf32>
    %c0_20 = arith.constant 0 : index
    %c0_21 = arith.constant 0 : index
    %31 = vector.load %arg11[%c0_20, %c0_21] : memref<64x16xf32, #tpu.memory_space<vmem>>, vector<64x16xf32>
    tpu.vector_store %arg11[%c0_20, %c0_21], %30 {strides = array<i32>} : memref<64x16xf32, #tpu.memory_space<vmem>>, vector<64x16xf32>,
    %c0_22 = arith.constant 0 : index
    %c0_23 = arith.constant 0 : index
    %32 = vector.load %arg9[%c0_22, %c0_23] : memref<64x1xf32, #tpu.memory_space<vmem>>, vector<64x1xf32>
    tpu.vector_store %arg9[%c0_22, %c0_23], %13 {strides = array<i32>} : memref<64x1xf32, #tpu.memory_space<vmem>>, vector<64x1xf32>,
    %c0_i32_24 = arith.constant 0 : i32
    %33 = arith.cmpi eq, %arg2, %c0_i32_24 : i32
    %34 = arith.extui %33 : i1 to i32
    %c0_i32_25 = arith.constant 0 : i32
    %35 = arith.cmpi ne, %34, %c0_i32_25 : i32
    scf.if %35 {
      %c0_26 = arith.constant 0 : index
      %c0_27 = arith.constant 0 : index
      %36 = vector.load %arg10[%c0_26, %c0_27] : memref<64x1xf32, #tpu.memory_space<vmem>>, vector<64x1xf32>
      %37 = tpu.reciprocal %36 {approx = true} : vector<64x1xf32> -> vector<64x1xf32>
      %c0_28 = arith.constant 0 : index
      %c0_29 = arith.constant 0 : index
      %38 = vector.load %arg11[%c0_28, %c0_29] : memref<64x16xf32, #tpu.memory_space<vmem>>, vector<64x16xf32>
      %39 = vector.broadcast %37 : vector<64x1xf32> to vector<64x16xf32>
      %40 = arith.mulf %38, %39 : vector<64x16xf32>
      %c0_30 = arith.constant 0 : index
      %41 = memref.load %arg7[%c0_30] : memref<1xf32, #tpu.memory_space<smem>>
      %42 = vector.broadcast %41 : f32 to vector<64x16xf32>
      %43 = arith.mulf %42, %40 : vector<64x16xf32>
      %c0_31 = arith.constant 0 : index
      %c0_32 = arith.constant 0 : index
      %c0_33 = arith.constant 0 : index
      %44 = vector.load %arg6[%c0_31, %c0_32, %c0_33] : memref<1x64x16xf32, #tpu.memory_space<vmem>>, vector<1x64x16xf32>
      %45 = vector.shape_cast %44 : vector<1x64x16xf32> to vector<64x16xf32>
      %46 = arith.addf %43, %45 : vector<64x16xf32>
      %c0_34 = arith.constant 0 : index
      %c0_35 = arith.constant 0 : index
      %c0_36 = arith.constant 0 : index
      %47 = vector.load %arg8[%c0_34, %c0_35, %c0_36] : memref<1x64x16xf32, #tpu.memory_space<vmem>>, vector<1x64x16xf32>
      %48 = vector.shape_cast %47 : vector<1x64x16xf32> to vector<64x16xf32>
      %49 = vector.shape_cast %46 : vector<64x16xf32> to vector<1x64x16xf32>
      tpu.vector_store %arg8[%c0_34, %c0_35, %c0_36], %49 {strides = array<i32>} : memref<1x64x16xf32, #tpu.memory_space<vmem>>, vector<1x64x16xf32>,
    } else {
    }
    return
  }
  func.func @transform_0(%arg0: i32, %arg1: i32, %arg2: i32) -> (i32, i32, i32) {
    %c0_i32 = arith.constant 0 : i32
    %c0_i32_0 = arith.constant 0 : i32
    return %arg0, %arg1, %c0_i32 : i32, i32, i32
  }
  func.func @transform_1(%arg0: i32, %arg1: i32, %arg2: i32) -> (i32, i32, i32) {
    %c0_i32 = arith.constant 0 : i32
    %c0_i32_0 = arith.constant 0 : i32
    return %arg0, %c0_i32, %arg2 : i32, i32, i32
  }
  func.func @transform_2(%arg0: i32, %arg1: i32, %arg2: i32) -> (i32, i32, i32) {
    %c0_i32 = arith.constant 0 : i32
    %c0_i32_0 = arith.constant 0 : i32
    return %arg0, %arg2, %c0_i32 : i32, i32, i32
  }
  func.func @transform_3(%arg0: i32, %arg1: i32, %arg2: i32) -> (i32, i32, i32) {
    %c0_i32 = arith.constant 0 : i32
    %c0_i32_0 = arith.constant 0 : i32
    return %arg0, %arg1, %c0_i32 : i32, i32, i32
  }
  func.func @transform_4(%arg0: i32, %arg1: i32, %arg2: i32) -> i32 {
    %c0_i32 = arith.constant 0 : i32
    %c0_i32_0 = arith.constant 0 : i32
    return %c0_i32 : i32
  }
  func.func @transform_5(%arg0: i32, %arg1: i32, %arg2: i32) -> (i32, i32, i32) {
    %c0_i32 = arith.constant 0 : i32
    %c0_i32_0 = arith.constant 0 : i32
    return %arg0, %arg1, %c0_i32 : i32, i32, i32
  }
}

</mosaic_0001>

<bundles_post_ra>
// kernel: tpu_custom_call.1
= control target key start
LH: loop header
LB: loop body
LE: loop exit
PB: predicated region body
PF: predicated region fallthrough
CT: control target
= control target key end

     0   :  { %s1366_s20 = smov 0   ;;  %s1368_s21 = smov 0   ;;  %s1659_s0 = inlined_call_operand.vmem [shape: bf16[2,64,2], index: 0, kind: input, shape index: {}]   ;;  %s1660_s1 = inlined_call_operand.vmem [shape: bf16[2,2,64], index: 1, kind: input, shape index: {}]   ;;  %s1661_s2 = inlined_call_operand.vmem [shape: bf16[2,64,16], index: 2, kind: input, shape index: {}]   ;;  %s1662_s3 = inlined_call_operand.vmem [shape: f32[2,64,16], index: 3, kind: input, shape index: {}]   ;;  %s1663_s4 = inlined_call_operand.<no memory space> [shape: f32[1], index: 4, kind: input, shape index: {}]   ;;  %s1664_s5 = inlined_call_operand.vmem [shape: f32[2,64,16], index: 5, kind: output, shape index: {}]  }
   0x1   :  { %10 = sst [smem:[#allocation5]] %s1663_s4  ;;  %s1370_s22 = smov 0  }
   0x2 LB: > { %s35_s4 = sadd.s32 1, %s1324_s21  ;;  %p1142_p0 = scmp.ge.s32.totalorder %s1328_s22, 1  ;;  %s1328_s22 = sphi %s1370_s22, %s16_s22   ;;  %s1324_s21 = sphi %s1368_s21, %s1666_s21   ;;  %s1320_s20 = sphi %s1366_s20, %s1665_s20  }
   0x3   : > { %p37_p1 = scmp.ge.s32.totalorder %s35_s4, 2  ;;  %p263_p2 = scmp.lt.s32.totalorder %s1328_s22, 3 }
   0x5   : > { %s1668_s4 = smov (%p37_p1, %s35_s4), 0  ;;  %p264_p3 = pnand %p1142_p0, %p263_p2 }
   0x6   : > { %p324_p4 = scmp.lt.s32.totalorder (!%p264_p3), %s1320_s20, 1  ;;  %vm450_vm0 = vcmask (!%p264_p3), 1040384   ;;  %vm437_vm1 = vcmask (!%p264_p3), 15360   ;;  %vm374_vm2 = vcmask (!%p264_p3), 7168   ;;  %v1330_v6 = vmov (!%p264_p3), -inf   ;;  %s966_s8 = sld [smem:[#allocation5]] (!%p264_p3) }
   0x7   : > { %267 = sbr.rel (%p264_p3) target bundleno = 845 (0x34d), region = 40  ;;  %377 = vst.msk [vmem:[#allocation2 + $0x10] sm:$0xff] (!%p264_p3), %vm374_vm2, %v1330_v6  ;;  %375 = vst.msk [vmem:[#allocation2] sm:$0xff] (!%p264_p3), %vm374_vm2, %v1330_v6  ;;  %vm527_vm3 = vcmask (!%p264_p3), 523264   ;;  %v1331_v22 = vmov (!%p264_p3), 0   ;;  %v1332_v24 = vmov (!%p264_p3), 0.0  }
   0x8   : > { %376 = vst.msk [vmem:[#allocation2 + $0x8] sm:$0xff] (!%p264_p3), %vm374_vm2, %v1330_v6  ;;  %378 = vst.msk [vmem:[#allocation2 + $0x18] sm:$0xff] (!%p264_p3), %vm374_vm2, %v1330_v6  ;;  %1249 = vset.pattern.permute.xlu1 (!%p264_p3), %v1331_v22  ;;  %1248 = vset.pattern.permute.xlu0 (!%p264_p3), %v1331_v22  ;;  %vm391_vm4 = vcmask (!%p264_p3), 130048  }
   0x9   : > { %379 = vst.msk [vmem:[#allocation2 + $0x20] sm:$0xff] (!%p264_p3), %vm374_vm2, %v1330_v6  ;;  %380 = vst.msk [vmem:[#allocation2 + $0x28] sm:$0xff] (!%p264_p3), %vm374_vm2, %v1330_v6 }
   0xa   : > { %381 = vst.msk [vmem:[#allocation2 + $0x30] sm:$0xff] (!%p264_p3), %vm374_vm2, %v1330_v6  ;;  %382 = vst.msk [vmem:[#allocation2 + $0x38] sm:$0xff] (!%p264_p3), %vm374_vm2, %v1330_v6 }
   0xb   : > { %385 = vst.msk [vmem:[#allocation3 + $0x10] sm:$0xff] (!%p264_p3), %vm374_vm2, %v1332_v24  ;;  %383 = vst.msk [vmem:[#allocation3] sm:$0xff] (!%p264_p3), %vm374_vm2, %v1332_v24 }
   0xc   : > { %384 = vst.msk [vmem:[#allocation3 + $0x8] sm:$0xff] (!%p264_p3), %vm374_vm2, %v1332_v24  ;;  %386 = vst.msk [vmem:[#allocation3 + $0x18] sm:$0xff] (!%p264_p3), %vm374_vm2, %v1332_v24 }
   0xd   : > { %387 = vst.msk [vmem:[#allocation3 + $0x20] sm:$0xff] (!%p264_p3), %vm374_vm2, %v1332_v24  ;;  %388 = vst.msk [vmem:[#allocation3 + $0x28] sm:$0xff] (!%p264_p3), %vm374_vm2, %v1332_v24 }
   0xe   : > { %s1670_s20 = smov (!%p324_p4, %s1320_s20), 1  ;;  %389 = vst.msk [vmem:[#allocation3 + $0x30] sm:$0xff] %vm374_vm2, %v1332_v24  ;;  %390 = vst.msk [vmem:[#allocation3 + $0x38] sm:$0xff] %vm374_vm2, %v1332_v24  ;;  %v1455_v25 = vld [vmem:[#allocation2 + $0x10] sm:$0xff]  ;;  %v1462_v30 = vld [vmem:[#allocation2] sm:$0xff] }
   0xf   : > { %s1169_s23 = sshll.u32 %s1670_s20, 5  ;;  %s338_s26 = scalar_lea.vmem %s1660_s1, %s1670_s20  ;;  %v1457_v27 = vld [vmem:[#allocation2 + $0x18] sm:$0xff]  ;;  %v1479_v36 = vld [vmem:[#allocation2 + $0x8] sm:$0xff]  ;;  %392 = vst.msk [vmem:[#allocation4] sm:$0xff] %vm391_vm4, %v1332_v24  ;;  %393 = vst.msk [vmem:[#allocation4 + $0x8] sm:$0xff] %vm391_vm4, %v1332_v24 }
  0x10   : > { %s331_s29 = scalar_lea.vmem %s1659_s0, %s1169_s23  ;;  %v408_v0 = vld [vmem:[%s338_s26] sm:$0x1]  ;;  %s1397_s7 = scalar_lea.vmem %s1661_s2, %s1169_s23  ;;  %v1502_v45 = vld [vmem:[#allocation2 + $0x28] sm:$0xff]  ;;  %394 = vst.msk [vmem:[#allocation4 + $0x10] sm:$0xff] %vm391_vm4, %v1332_v24  ;;  %395 = vst.msk [vmem:[#allocation4 + $0x18] sm:$0xff] %vm391_vm4, %v1332_v24 }
  0x11   : > { %1220 = vmatprep.subr.msk.bf16.mxu0 %vm450_vm0, %v408_v0  ;;  %v452_v1 = vsel %vm450_vm0, %v408_v0, 0  ;;  %v1250_v2 = vld [vmem:[%s331_s29] sm:$0xff]   ;;  %v1251_v3 = vld [vmem:[%s331_s29 + $0x8] sm:$0xff]   ;;  %v1252_v4 = vld [vmem:[%s331_s29 + $0x10] sm:$0xff]   ;;  %396 = vst.msk [vmem:[#allocation4 + $0x20] sm:$0xff] %vm391_vm4, %v1332_v24  ;;  %s1171_s9 = sshll.u32 %s1670_s20, 6 }
  0x12   : > { %1187 = vmatpush3.bf16.msra.mxu0 %v452_v1  ;;  %1188 = vmatprep.mubr.msk.bf16.mxu0 %vm437_vm1, %v1250_v2  ;;  %v1253_v5 = vld [vmem:[%s331_s29 + $0x18] sm:$0xff]   ;;  %v1487_v38 = vld [vmem:[#allocation2 + $0x20] sm:$0xff]  ;;  %v1495_v43 = vld [vmem:[#allocation2 + $0x30] sm:$0xff]  ;;  %397 = vst.msk [vmem:[#allocation4 + $0x28] sm:$0xff] %vm391_vm4, %v1332_v24  ;;  %s1619_s12 = scalar_lea.vmem %s1662_s3, %s1171_s9  ;;  %s1625_s15 = scalar_lea.vmem %s1664_s5, %s1171_s9 }
  0x13   : > { %v1254_v48 = vld [vmem:[%s1397_s7] sm:$0xff]   ;;  %v1520_v53 = vld [vmem:[#allocation2 + $0x38] sm:$0xff]  ;;  %v1255_v55 = vld [vmem:[%s1397_s7 + $0x8] sm:$0xff]   ;;  %398 = vst.msk [vmem:[#allocation4 + $0x30] sm:$0xff] %vm391_vm4, %v1332_v24 }
  0x14   : > { %1196 = vmatprep.subr.bf16.mxu0 %v1254_v48  ;;  %1212 = vmatprep.subr.bf16.mxu1 %v1254_v48  ;;  %v1256_v59 = vld [vmem:[%s1397_s7 + $0x10] sm:$0xff]   ;;  %v1257_v60 = vld [vmem:[%s1397_s7 + $0x18] sm:$0xff]   ;;  %399 = vst.msk [vmem:[#allocation4 + $0x38] sm:$0xff] %vm391_vm4, %v1332_v24 }
  0x15   : > { %1189 = vmatmul.mubr.msk.bf16.vlgmr.msra.gmra.mrb[0].mxu0 %vm437_vm1, %v1251_v3  ;;  %1216 = vmatpush3.bf16.msra.mxu1 %v1254_v48 }
  0x16   : > { %1192 = vmatprep.mubr.msk.bf16.mxu0 %vm437_vm1, %v1252_v4  ;;  %1197 = vmatpush3.bf16.msra.mxu0 %v1254_v48 }
  0x17   : > { %1198 = vmatprep.subr.bf16.mxu0 %v1255_v55  ;;  %1213 = vmatprep.subr.bf16.mxu1 %v1255_v55 }
  0x19   : > { %1217 = vmatpush3.bf16.msra.mxu1 %v1255_v55 }
  0x1a   : > { %1199 = vmatpush3.bf16.msra.mxu0 %v1255_v55  ;;  %1214 = vmatprep.subr.bf16.mxu1 %v1256_v59 }
  0x1b   : > { %1200 = vmatprep.subr.bf16.mxu0 %v1256_v59 }
  0x1d   : > { %1193 = vmatmul.mubr.msk.bf16.gmra.mrb[4].mxu0 %vm437_vm1, %v1253_v5  ;;  %1218 = vmatpush3.bf16.msra.mxu1 %v1256_v59 }
  0x1e   : > { %1201 = vmatpush3.bf16.msra.mxu0 %v1256_v59  ;;  %1215 = vmatprep.subr.bf16.mxu1 %v1257_v60 }
  0x1f   : > { %1202 = vmatprep.subr.bf16.mxu0 %v1257_v60 }
  0x21   : > { %1219 = vmatpush3.bf16.msra.mxu1 %v1257_v60 }
  0x22   : > { %1203 = vmatpush3.bf16.msra.mxu0 %v1257_v60 }
  0xe8   : > { %v1407_v7 = vpop.f32.mrb[0].mxu0 }
  0xe9   : > { %v1409_v8 = vpop.f32.mrb[1].mxu0  ;;  %v534_v9 = vsel %vm527_vm3, %v1407_v7, -inf }
  0xea   : > { %535 = vmax.xlane.f32.xlu0 %v534_v9  ;;  %v1413_v10 = vpop.f32.mrb[2].mxu0  ;;  %v528_v13 = vsel %vm527_vm3, %v1409_v8, -inf }
  0xeb   : > { %v1415_v11 = vpop.f32.mrb[3].mxu0  ;;  %v537_v12 = vsel %vm527_vm3, %v1413_v10, -inf }
  0xec   : > { %538 = vmax.xlane.f32.xlu1 %v537_v12  ;;  %v531_v16 = vsel %vm527_vm3, %v1415_v11, -inf }
  0xee   : > { %529 = vmax.xlane.f32.xlu0 %v528_v13 }
  0xf0   : > { %v1421_v14 = vpop.f32.mrb[4].mxu0 }
  0xf1   : > { %v1423_v15 = vpop.f32.mrb[5].mxu0  ;;  %v546_v20 = vsel %vm527_vm3, %v1421_v14, -inf }
  0xf2   : > { %532 = vmax.xlane.f32.xlu0 %v531_v16  ;;  %v540_v17 = vsel %vm527_vm3, %v1423_v15, -inf  ;;  %v1429_v18 = vpop.f32.mrb[6].mxu0 }
  0xf3   : > { %541 = vmax.xlane.f32.xlu1 %v540_v17  ;;  %v1431_v19 = vpop.f32.mrb[7].mxu0  ;;  %v549_v23 = vsel %vm527_vm3, %v1429_v18, -inf }
  0xf4   : > { %v543_v21 = vsel %vm527_vm3, %v1431_v19, -inf }
  0xf6   : > { %547 = vmax.xlane.f32.xlu0 %v546_v20 }
  0xf7   : > { %544 = vmax.xlane.f32.xlu1 %v543_v21 }
  0xfb   : > { %550 = vmax.xlane.f32.xlu1 %v549_v23 }
 0x177   : > { %v536_v26 = vpop.xlane.xlu0 %535 }
 0x178   : > { %v1460_v28 = vmax.f32 %v1455_v25, %v536_v26 }
 0x179   : > { %v539_v29 = vpop.xlane.xlu1 %538 }
 0x17a   : > { %v562_v31 = vsub.f32 %v1455_v25, %v1460_v28  ;;  %885 = vst.msk [vmem:[#allocation2 + $0x10] sm:$0xff] %vm374_vm2, %v1460_v28  ;;  %v1469_v32 = vmax.f32 %v1457_v27, %v539_v29  ;;  %596 = vperm.xlu1 %1249, %v1460_v28  }
 0x17b   : > { %v530_v33 = vpop.xlane.xlu0 %529 }
 0x17c   : > { %v563_v34 = vsub.f32 %v1457_v27, %v1469_v32  ;;  %886 = vst.msk [vmem:[#allocation2 + $0x18] sm:$0xff] %vm374_vm2, %v1469_v32  ;;  %v1477_v35 = vmax.f32 %v1462_v30, %v530_v33 }
 0x17e   : > { %v560_v37 = vsub.f32 %v1462_v30, %v1477_v35  ;;  %883 = vst.msk [vmem:[#allocation2] sm:$0xff] %vm374_vm2, %v1477_v35  ;;  %586 = vperm.xlu0 %1248, %v1477_v35   ;;  %601 = vperm.xlu1 %1249, %v1469_v32  }
 0x17f   : > { %v533_v39 = vpop.xlane.xlu0 %532 }
 0x180   : > { %v1490_v40 = vmax.f32 %v1479_v36, %v533_v39  ;;  %v542_v41 = vpop.xlane.xlu1 %541 }
 0x181   : > { %v1493_v42 = vmax.f32 %v1487_v38, %v542_v41 }
 0x182   : > { %v561_v44 = vsub.f32 %v1479_v36, %v1490_v40  ;;  %884 = vst.msk [vmem:[#allocation2 + $0x8] sm:$0xff] %vm374_vm2, %v1490_v40  ;;  %591 = vperm.xlu1 %1249, %v1490_v40   ;;  %v650_v40 = vld [vmem:[#allocation3 + $0x10] sm:$0xff] }
 0x183   : > { %v564_v46 = vsub.f32 %v1487_v38, %v1493_v42  ;;  %887 = vst.msk [vmem:[#allocation2 + $0x20] sm:$0xff] %vm374_vm2, %v1493_v42  ;;  %v548_v47 = vpop.xlane.xlu0 %547 }
 0x184   : > { %v1510_v49 = vmax.f32 %v1495_v43, %v548_v47  ;;  %v545_v50 = vpop.xlane.xlu1 %544 }
 0x185   : > { %v1513_v51 = vmax.f32 %v1502_v45, %v545_v50  ;;  %v576_v36 = vmul.f32 1.442695, %v564_v46 }
 0x186   : > { %v566_v52 = vsub.f32 %v1495_v43, %v1510_v49  ;;  %889 = vst.msk [vmem:[#allocation2 + $0x30] sm:$0xff] %vm374_vm2, %v1510_v49  ;;  %616 = vperm.xlu1 %1249, %v1510_v49  }
 0x187   : > { %v565_v54 = vsub.f32 %v1502_v45, %v1513_v51  ;;  %888 = vst.msk [vmem:[#allocation2 + $0x28] sm:$0xff] %vm374_vm2, %v1513_v51 }
 0x188   : > { %v551_v56 = vpop.xlane.xlu1 %550  ;;  %v580_v25 = vmul.f32 1.442695, %v566_v52  ;;  %v651_v52 = vld [vmem:[#allocation3 + $0x18] sm:$0xff] }
 0x189   : > { %v1528_v57 = vmax.f32 %v1520_v53, %v551_v56  ;;  %v578_v30 = vmul.f32 1.442695, %v565_v54 }
 0x18a   : > { %606 = vperm.xlu1 %1249, %v1493_v42  }
 0x18b   : > { %v567_v58 = vsub.f32 %v1520_v53, %v1528_v57  ;;  %890 = vst.msk [vmem:[#allocation2 + $0x38] sm:$0xff] %vm374_vm2, %v1528_v57 }
 0x18d   : > { %v582_v27 = vmul.f32 1.442695, %v567_v58 }
 0x18e   : > { %611 = vperm.xlu1 %1249, %v1513_v51   ;;  %v649_v51 = vld [vmem:[#allocation3 + $0x8] sm:$0xff] }
 0x192   : > { %621 = vperm.xlu1 %1249, %v1528_v57  }
 0x1f9   : > { %v597_v61 = vpop.permute.xlu1 %596 }
 0x1fa   : > { %v626_v62 = vsub.f32 %v1407_v7, %v597_v61 }
 0x1fc   : > { %v636_v63 = vmul.f32 1.442695, %v626_v62 }
 0x1fd   : > { %v587_v0 = vpop.permute.xlu0 %586  ;;  %v602_v1 = vpop.permute.xlu1 %601 }
 0x1fe   : > { %1258 = vpow2.f32 %v636_v63  ;;  %v624_v2 = vsub.f32 %v1409_v8, %v587_v0  ;;  %v627_v3 = vsub.f32 %v1413_v10, %v602_v1 }
 0x200   : > { %v632_v4 = vmul.f32 1.442695, %v624_v2  ;;  %v638_v5 = vmul.f32 1.442695, %v627_v3  ;;  %v570_v2 = vmul.f32 1.442695, %v561_v44 }
 0x201   : > { %v592_v6 = vpop.permute.xlu1 %591  ;;  %v568_v3 = vmul.f32 1.442695, %v560_v37  ;;  %v648_v44 = vld [vmem:[#allocation3] sm:$0xff] }
 0x202   : > { %1260 = vpow2.f32 %v632_v4  ;;  %v625_v9 = vsub.f32 %v1415_v11, %v592_v6  ;;  %v572_v4 = vmul.f32 1.442695, %v562_v31 }
 0x203   : > { %1262 = vpow2.f32 %v638_v5  ;;  %v574_v5 = vmul.f32 1.442695, %v563_v34 }
 0x204   : > { %v634_v12 = vmul.f32 1.442695, %v625_v9 }
 0x205   : > { %v617_v13 = vpop.permute.xlu1 %616 }
 0x206   : > { %1264 = vpow2.f32 %v634_v12  ;;  %v630_v7 = vsub.f32 %v1421_v14, %v617_v13 }
 0x208   : > { %v1259_v16 = vpop.eup %1258  ;;  %v644_v21 = vmul.f32 1.442695, %v630_v7 }
 0x209   : > { %v607_v17 = vpop.permute.xlu1 %606  ;;  %v670_v20 = vsel %vm527_vm3, %v1259_v16, 0.0 }
 0x20a   : > { %v628_v8 = vsub.f32 %v1423_v15, %v607_v17  ;;  %671 = vadd.xlane.f32.xlu0 %v670_v20 }
 0x20c   : > { %v1261_v10 = vpop.eup %1260  ;;  %v640_v22 = vmul.f32 1.442695, %v628_v8  ;;  %v654_v8 = vld [vmem:[#allocation3 + $0x30] sm:$0xff] }
 0x20d   : > { %v1263_v23 = vpop.eup %1262  ;;  %v612_v26 = vpop.permute.xlu1 %611  ;;  %v664_v11 = vsel %vm527_vm3, %v1261_v10, 0.0 }
 0x20e   : > { %v762_v29 = vpack.c.bf16 %v1263_v23, %v1259_v16  ;;  %1266 = vpow2.f32 %v640_v22  ;;  %v629_v33 = vsub.f32 %v1431_v19, %v612_v26  ;;  %665 = vadd.xlane.f32.xlu1 %v664_v11  ;;  %v673_v47 = vsel %vm527_vm3, %v1263_v23, 0.0  ;;  %v652_v16 = vld [vmem:[#allocation3 + $0x20] sm:$0xff] }
 0x20f   : > { %1268 = vpow2.f32 %v644_v21 }
 0x210   : > { %v1265_v39 = vpop.eup %1264  ;;  %v642_v14 = vmul.f32 1.442695, %v629_v33  ;;  %v655_v33 = vld [vmem:[#allocation3 + $0x38] sm:$0xff] }
 0x211   : > { %v622_v41 = vpop.permute.xlu1 %621  ;;  %v667_v15 = vsel %vm527_vm3, %v1265_v39, 0.0  ;;  %v761_v48 = vpack.c.bf16 %v1265_v39, %v1261_v10  ;;  %v653_v10 = vld [vmem:[#allocation3 + $0x28] sm:$0xff] }
 0x212   : > { %1270 = vpow2.f32 %v642_v14  ;;  %v631_v50 = vsub.f32 %v1429_v18, %v622_v41  ;;  %674 = vadd.xlane.f32.xlu1 %v673_v47  ;;  %668 = vadd.xlane.f32.xlu0 %v667_v15 }
 0x213   : > { %1204 = vmatprep.mubr.msk.bf16.mxu0 %vm527_vm3, %v761_v48 }
 0x214   : > { %v646_v55 = vmul.f32 1.442695, %v631_v50  ;;  %1205 = vmatmul.mubr.msk.bf16.vlgmr.msra.gmra.mrb[8].mxu0 %vm527_vm3, %v762_v29 }
 0x216   : > { %1272 = vpow2.f32 %v646_v55 }
 0x217   : > { %1274 = vpow2.f32 %v570_v2 }
 0x218   : > { %v1267_v19 = vpop.eup %1266  ;;  %1276 = vpow2.f32 %v568_v3 }
 0x219   : > { %v676_v56 = vsel %vm527_vm3, %v1267_v19, 0.0  ;;  %v1269_v59 = vpop.eup %1268  ;;  %1278 = vpow2.f32 %v572_v4  ;;  %v707_v4 = vld [vmem:[#allocation4 + $0x10] sm:$0xff] }
 0x21a   : > { %677 = vadd.xlane.f32.xlu0 %v676_v56  ;;  %v682_v61 = vsel %vm527_vm3, %v1269_v59, 0.0  ;;  %1280 = vpow2.f32 %v574_v5 }
 0x21b   : > { %1282 = vpow2.f32 %v576_v36  ;;  %v705_v36 = vld [vmem:[#allocation4] sm:$0xff] }
 0x21c   : > { %v1271_v60 = vpop.eup %1270  ;;  %1284 = vpow2.f32 %v578_v30  ;;  %v708_v30 = vld [vmem:[#allocation4 + $0x18] sm:$0xff] }
 0x21d   : > { %v679_v62 = vsel %vm527_vm3, %v1271_v60, 0.0  ;;  %v763_v63 = vpack.c.bf16 %v1271_v60, %v1267_v19  ;;  %1286 = vpow2.f32 %v580_v25 }
 0x21e   : > { %683 = vadd.xlane.f32.xlu0 %v682_v61  ;;  %680 = vadd.xlane.f32.xlu1 %v679_v62  ;;  %1288 = vpow2.f32 %v582_v27  ;;  %v706_v27 = vld [vmem:[#allocation4 + $0x8] sm:$0xff] }
 0x21f   : > { %1208 = vmatprep.mubr.msk.bf16.mxu1 %vm527_vm3, %v763_v63 }
 0x220   : > { %v1273_v18 = vpop.eup %1272 }
 0x221   : > { %v685_v0 = vsel %vm527_vm3, %v1273_v18, 0.0  ;;  %v764_v1 = vpack.c.bf16 %v1273_v18, %v1269_v59  ;;  %v1275_v28 = vpop.eup %1274 }
 0x222   : > { %686 = vadd.xlane.f32.xlu1 %v685_v0  ;;  %v1277_v31 = vpop.eup %1276  ;;  %v657_v54 = vmul.f32 %v1275_v28, %v649_v51 }
 0x223   : > { %1209 = vmatmul.mubr.msk.bf16.vlgmr.msra.gmra.mrb[0].mxu1 %vm527_vm3, %v764_v1  ;;  %v1279_v32 = vpop.eup %1278  ;;  %v656_v46 = vmul.f32 %v1277_v31, %v648_v44 }
 0x224   : > { %v1281_v34 = vpop.eup %1280  ;;  %v658_v42 = vmul.f32 %v1279_v32, %v650_v40 }
 0x225   : > { %v1283_v24 = vpop.eup %1282  ;;  %v659_v57 = vmul.f32 %v1281_v34, %v651_v52  ;;  %v709_v52 = vld [vmem:[#allocation4 + $0x20] sm:$0xff] }
 0x226   : > { %v1285_v35 = vpop.eup %1284  ;;  %v660_v17 = vmul.f32 %v1283_v24, %v652_v16 }
 0x227   : > { %v1287_v37 = vpop.eup %1286  ;;  %v661_v26 = vmul.f32 %v1285_v35, %v653_v10 }
 0x228   : > { %v1289_v38 = vpop.eup %1288  ;;  %v662_v23 = vmul.f32 %v1287_v37, %v654_v8 }
 0x229   : > { %v663_v15 = vmul.f32 %v1289_v38, %v655_v33 }
 0x233   : > { %720 = vperm.xlu1 %1249, %v1275_v28  }
 0x234   : > { %715 = vperm.xlu0 %1248, %v1277_v31  }
 0x237   : > { %725 = vperm.xlu1 %1249, %v1279_v32  }
 0x238   : > { %730 = vperm.xlu0 %1248, %v1281_v34  }
 0x23b   : > { %735 = vperm.xlu1 %1249, %v1283_v24  }
 0x23c   : > { %740 = vperm.xlu0 %1248, %v1285_v35  }
 0x23f   : > { %745 = vperm.xlu1 %1249, %v1287_v37  }
 0x240   : > { %750 = vperm.xlu0 %1248, %v1289_v38  }
 0x297   : > { %v672_v43 = vpop.xlane.xlu0 %671 }
 0x298   : > { %v690_v45 = vadd.f32 %v672_v43, %v658_v42 }
 0x29a   : > { %699 = vst.msk [vmem:[#allocation3 + $0x10] sm:$0xff] %vm374_vm2, %v690_v45 }
 0x29b   : > { %v666_v49 = vpop.xlane.xlu1 %665 }
 0x29c   : > { %v688_v53 = vadd.f32 %v666_v49, %v656_v46  ;;  %v711_v49 = vld [vmem:[#allocation4 + $0x30] sm:$0xff] }
 0x29e   : > { %697 = vst.msk [vmem:[#allocation3] sm:$0xff] %vm374_vm2, %v688_v53  ;;  %v712_v53 = vld [vmem:[#allocation4 + $0x38] sm:$0xff] }
 0x29f   : > { %v669_v58 = vpop.xlane.xlu0 %668  ;;  %v675_v6 = vpop.xlane.xlu1 %674 }
 0x2a0   : > { %v689_v9 = vadd.f32 %v669_v58, %v657_v54  ;;  %v691_v12 = vadd.f32 %v675_v6, %v659_v57  ;;  %v710_v57 = vld [vmem:[#allocation4 + $0x28] sm:$0xff] }
 0x2a1   : > { %v896_v13 = vld [vmem:[#allocation3 + $0x10] sm:$0xff] }
 0x2a2   : > { %698 = vst.msk [vmem:[#allocation3 + $0x8] sm:$0xff] %vm374_vm2, %v689_v9  ;;  %700 = vst.msk [vmem:[#allocation3 + $0x18] sm:$0xff] %vm374_vm2, %v691_v12  ;;  %1290 = vrcp.f32 %v896_v13 }
 0x2a5   : > { %v894_v7 = vld [vmem:[#allocation3] sm:$0xff] }
 0x2a6   : > { %1292 = vrcp.f32 %v894_v7 }
 0x2a7   : > { %v678_v20 = vpop.xlane.xlu0 %677 }
 0x2a8   : > { %v692_v21 = vadd.f32 %v678_v20, %v660_v17 }
 0x2a9   : > { %v897_v22 = vld [vmem:[#allocation3 + $0x18] sm:$0xff]  ;;  %v895_v39 = vld [vmem:[#allocation3 + $0x8] sm:$0xff] }
 0x2aa   : > { %701 = vst.msk [vmem:[#allocation3 + $0x20] sm:$0xff] %vm374_vm2, %v692_v21  ;;  %1294 = vrcp.f32 %v897_v22 }
 0x2ab   : > { %v684_v11 = vpop.xlane.xlu0 %683  ;;  %v681_v29 = vpop.xlane.xlu1 %680  ;;  %1296 = vrcp.f32 %v895_v39 }
 0x2ac   : > { %v1291_v14 = vpop.eup %1290  ;;  %v694_v41 = vadd.f32 %v684_v11, %v662_v23  ;;  %v693_v47 = vadd.f32 %v681_v29, %v661_v26  ;;  %v967_v23 = vstv %s966_s8  ;;  %v978_v29 = vld [vmem:[%s1619_s12 + $0x10] sm:$0xff] }
 0x2ad   : > { %930 = vperm.xlu1 %1249, %v1291_v14  }
 0x2ae   : > { %703 = vst.msk [vmem:[#allocation3 + $0x30] sm:$0xff] %vm374_vm2, %v694_v41  ;;  %702 = vst.msk [vmem:[#allocation3 + $0x28] sm:$0xff] %vm374_vm2, %v693_v47 }
 0x2af   : > { %v687_v48 = vpop.xlane.xlu1 %686 }
 0x2b0   : > { %v1293_v50 = vpop.eup %1292  ;;  %v695_v55 = vadd.f32 %v687_v48, %v663_v15  ;;  %v976_v15 = vld [vmem:[%s1619_s12] sm:$0xff] }
 0x2b1   : > { %920 = vperm.xlu1 %1249, %v1293_v50   ;;  %v898_v19 = vld [vmem:[#allocation3 + $0x20] sm:$0xff] }
 0x2b2   : > { %704 = vst.msk [vmem:[#allocation3 + $0x38] sm:$0xff] %vm374_vm2, %v695_v55  ;;  %1298 = vrcp.f32 %v898_v19 }
 0x2b3   : > { %v721_v2 = vpop.permute.xlu1 %720  ;;  %v716_v3 = vpop.permute.xlu0 %715 }
 0x2b4   : > { %v1295_v56 = vpop.eup %1294  ;;  %v753_v31 = vmul.f32 %v716_v3, %v705_v36  ;;  %v754_v37 = vmul.f32 %v721_v2, %v706_v27  ;;  %v980_v36 = vld [vmem:[%s1619_s12 + $0x20] sm:$0xff] }
 0x2b5   : > { %935 = vperm.xlu0 %1248, %v1295_v56   ;;  %v900_v59 = vld [vmem:[#allocation3 + $0x30] sm:$0xff]  ;;  %v899_v60 = vld [vmem:[#allocation3 + $0x28] sm:$0xff]  ;;  %v1297_v61 = vpop.eup %1296 }
 0x2b6   : > { %1300 = vrcp.f32 %v900_v59  ;;  %v979_v59 = vld [vmem:[%s1619_s12 + $0x18] sm:$0xff] }
 0x2b7   : > { %1302 = vrcp.f32 %v899_v60  ;;  %v726_v5 = vpop.permute.xlu1 %725  ;;  %v731_v25 = vpop.permute.xlu0 %730 }
 0x2b8   : > { %v755_v28 = vmul.f32 %v726_v5, %v707_v4  ;;  %v756_v34 = vmul.f32 %v731_v25, %v708_v30 }
 0x2b9   : > { %925 = vperm.xlu0 %1248, %v1297_v61   ;;  %v901_v62 = vld [vmem:[#allocation3 + $0x38] sm:$0xff] }
 0x2ba   : > { %1304 = vrcp.f32 %v901_v62 }
 0x2bb   : > { %v736_v45 = vpop.permute.xlu1 %735  ;;  %v741_v46 = vpop.permute.xlu0 %740 }
 0x2bc   : > { %v1299_v63 = vpop.eup %1298  ;;  %v757_v6 = vmul.f32 %v736_v45, %v709_v52  ;;  %v758_v7 = vmul.f32 %v741_v46, %v710_v57 }
 0x2bd   : > { %940 = vperm.xlu1 %1249, %v1299_v63  }
 0x2bf   : > { %v746_v51 = vpop.permute.xlu1 %745  ;;  %v751_v54 = vpop.permute.xlu0 %750 }
 0x2c0   : > { %v1301_v18 = vpop.eup %1300  ;;  %v759_v58 = vmul.f32 %v746_v51, %v711_v49  ;;  %v760_v12 = vmul.f32 %v751_v54, %v712_v53  ;;  %v983_v49 = vld [vmem:[%s1619_s12 + $0x38] sm:$0xff] }
 0x2c1   : > { %v1303_v0 = vpop.eup %1302  ;;  %950 = vperm.xlu1 %1249, %v1301_v18  }
 0x2c2   : > { %945 = vperm.xlu0 %1248, %v1303_v0   ;;  %v977_v0 = vld [vmem:[%s1619_s12 + $0x8] sm:$0xff] }
 0x2c4   : > { %v1305_v1 = vpop.eup %1304 }
 0x2c6   : > { %955 = vperm.xlu0 %1248, %v1305_v1  }
 0x2e7   : > { %v1206_v32 = vpop.f32.mrb[8].mxu0 }
 0x2e8   : > { %v868_v24 = vadd.f32 %v1206_v32, %v755_v28  ;;  %v835_v35 = vpop.f32.mrb[9].mxu0 }
 0x2e9   : > { %v866_v38 = vadd.f32 %v835_v35, %v753_v31  ;;  %v1207_v40 = vpop.f32.mrb[10].mxu0  ;;  %v982_v35 = vld [vmem:[%s1619_s12 + $0x30] sm:$0xff] }
 0x2ea   : > { %877 = vst.msk [vmem:[#allocation4 + $0x10] sm:$0xff] %vm391_vm4, %v868_v24  ;;  %v869_v42 = vadd.f32 %v1207_v40, %v756_v34  ;;  %v838_v43 = vpop.f32.mrb[11].mxu0 }
 0x2eb   : > { %875 = vst.msk [vmem:[#allocation4] sm:$0xff] %vm391_vm4, %v866_v38  ;;  %v867_v44 = vadd.f32 %v838_v43, %v754_v37  ;;  %v981_v37 = vld [vmem:[%s1619_s12 + $0x28] sm:$0xff] }
 0x2ec   : > { %878 = vst.msk [vmem:[#allocation4 + $0x18] sm:$0xff] %vm391_vm4, %v869_v42 }
 0x2ed   : > { %876 = vst.msk [vmem:[#allocation4 + $0x8] sm:$0xff] %vm391_vm4, %v867_v44 }
 0x2f1   : > { %v912_v22 = vld [vmem:[#allocation4 + $0x10] sm:$0xff] }
 0x2f2   : > { %v910_v39 = vld [vmem:[#allocation4] sm:$0xff] }
 0x2f3   : > { %v913_v50 = vld [vmem:[#allocation4 + $0x18] sm:$0xff] }
 0x2f4   : > { %v911_v62 = vld [vmem:[#allocation4 + $0x8] sm:$0xff] }
 0x2f6   : > { %v1210_v9 = vpop.f32.mrb[0].mxu1 }
 0x2f7   : > { %v872_v13 = vadd.f32 %v1210_v9, %v759_v58  ;;  %v851_v16 = vpop.f32.mrb[1].mxu1 }
 0x2f8   : > { %v870_v17 = vadd.f32 %v851_v16, %v757_v6  ;;  %v1211_v20 = vpop.f32.mrb[2].mxu1 }
 0x2f9   : > { %881 = vst.msk [vmem:[#allocation4 + $0x30] sm:$0xff] %vm391_vm4, %v872_v13  ;;  %v873_v8 = vadd.f32 %v1211_v20, %v760_v12  ;;  %v854_v10 = vpop.f32.mrb[3].mxu1 }
 0x2fa   : > { %879 = vst.msk [vmem:[#allocation4 + $0x20] sm:$0xff] %vm391_vm4, %v870_v17  ;;  %v871_v21 = vadd.f32 %v854_v10, %v758_v7 }
 0x2fb   : > { %882 = vst.msk [vmem:[#allocation4 + $0x38] sm:$0xff] %vm391_vm4, %v873_v8 }
 0x2fc   : > { %880 = vst.msk [vmem:[#allocation4 + $0x28] sm:$0xff] %vm391_vm4, %v871_v21 }
 0x300   : > { %v916_v25 = vld [vmem:[#allocation4 + $0x30] sm:$0xff] }
 0x301   : > { %v914_v2 = vld [vmem:[#allocation4 + $0x20] sm:$0xff] }
 0x302   : > { %v917_v43 = vld [vmem:[#allocation4 + $0x38] sm:$0xff] }
 0x303   : > { %v915_v31 = vld [vmem:[#allocation4 + $0x28] sm:$0xff] }
 0x32c   : > { %v931_v26 = vpop.permute.xlu1 %930 }
 0x32d   : > { %v960_v11 = vmul.f32 %v931_v26, %v912_v22 }
 0x32f   : > { %v970_v33 = vmul.f32 %v967_v23, %v960_v11 }
 0x330   : > { %v921_v14 = vpop.permute.xlu1 %920 }
 0x331   : > { %v986_v41 = vadd.f32 %v978_v29, %v970_v33  ;;  %v958_v47 = vmul.f32 %v921_v14, %v910_v39 }
 0x333   : > { %994 = vst.msk [vmem:[%s1625_s15 + $0x10] sm:$0xff] %vm391_vm4, %v986_v41  ;;  %v968_v48 = vmul.f32 %v967_v23, %v958_v47 }
 0x334   : > { %v936_v55 = vpop.permute.xlu0 %935 }
 0x335   : > { %v984_v19 = vadd.f32 %v976_v15, %v968_v48  ;;  %v961_v56 = vmul.f32 %v936_v55, %v913_v50 }
 0x337   : > { %992 = vst.msk [vmem:[%s1625_s15] sm:$0xff] %vm391_vm4, %v984_v19  ;;  %v971_v60 = vmul.f32 %v967_v23, %v961_v56 }
 0x338   : > { %v926_v61 = vpop.permute.xlu0 %925 }
 0x339   : > { %v987_v63 = vadd.f32 %v979_v59, %v971_v60  ;;  %v959_v18 = vmul.f32 %v926_v61, %v911_v62 }
 0x33b   : > { %995 = vst.msk [vmem:[%s1625_s15 + $0x18] sm:$0xff] %vm391_vm4, %v987_v63  ;;  %v969_v1 = vmul.f32 %v967_v23, %v959_v18 }
 0x33c   : > { %v941_v3 = vpop.permute.xlu1 %940 }
 0x33d   : > { %v985_v4 = vadd.f32 %v977_v0, %v969_v1  ;;  %v962_v5 = vmul.f32 %v941_v3, %v914_v2 }
 0x33f   : > { %993 = vst.msk [vmem:[%s1625_s15 + $0x8] sm:$0xff] %vm391_vm4, %v985_v4  ;;  %v972_v30 = vmul.f32 %v967_v23, %v962_v5 }
 0x340   : > { %v951_v27 = vpop.permute.xlu1 %950 }
 0x341   : > { %v988_v28 = vadd.f32 %v980_v36, %v972_v30  ;;  %v946_v32 = vpop.permute.xlu0 %945  ;;  %v964_v34 = vmul.f32 %v951_v27, %v916_v25 }
 0x342   : > { %v963_v24 = vmul.f32 %v946_v32, %v915_v31 }
 0x343   : > { %996 = vst.msk [vmem:[%s1625_s15 + $0x20] sm:$0xff] %vm391_vm4, %v988_v28  ;;  %v974_v38 = vmul.f32 %v967_v23, %v964_v34 }
 0x344   : > { %v973_v40 = vmul.f32 %v967_v23, %v963_v24 }
 0x345   : > { %v990_v42 = vadd.f32 %v982_v35, %v974_v38  ;;  %v956_v44 = vpop.permute.xlu0 %955 }
 0x346   : > { %v989_v45 = vadd.f32 %v981_v37, %v973_v40  ;;  %v965_v46 = vmul.f32 %v956_v44, %v917_v43 }
 0x347   : > { %998 = vst.msk [vmem:[%s1625_s15 + $0x30] sm:$0xff] %vm391_vm4, %v990_v42 }
 0x348   : > { %997 = vst.msk [vmem:[%s1625_s15 + $0x28] sm:$0xff] %vm391_vm4, %v989_v45  ;;  %v975_v51 = vmul.f32 %v967_v23, %v965_v46 }
 0x34a   : > { %v991_v52 = vadd.f32 %v983_v49, %v975_v51 }
 0x34c   : > { %999 = vst.msk [vmem:[%s1625_s15 + $0x38] sm:$0xff] %vm391_vm4, %v991_v52 }
 0x34d PF: > { %s16_s22 = sadd.s32 1, %s1328_s22   ;;  %s1665_s20 = smov %s1324_s21 }
 0x34e   : > { %p13_p5 = scmp.ge.s32.totalorder %s16_s22, 4   ;;  %s1666_s21 = smov %s1668_s4 }
 0x350   :  { %15 = sbr.rel (!%p13_p5) target bundleno = 2 (0x2), region = 87 }

</bundles_post_ra>
